<compile_context>
chip_gen: v7x
topology: tpu7x:2x2x1
jax: 0.10.0
libtpu: 0.0.40
codegen_flags: <defaults>
</compile_context>

<pallas_src>
import functools

import jax
import jax.numpy as jnp
from jax.experimental import pallas as pl
from jax.experimental.pallas import tpu as pltpu


def _dlinear_kernel(x_ref, w_ref, b_ref, o_ref):
    # x_ref : (P, tN)  time on sublanes, series tile on lanes (batch squeezed)
    # w_ref : (Q, P)   effective weight Ws + (Wt - Ws) @ A   (grid-resident)
    # b_ref : (Q, 1)   summed bias bs + bt                   (grid-resident, f32)
    # o_ref : (Q, tN)  lane-dense output tile
    o_ref[...] = (
        jnp.dot(w_ref[...], x_ref[...], preferred_element_type=jnp.float32)
        + b_ref[...]
    ).astype(o_ref.dtype)


def _make_moving_avg_matrix(t_window: int, kernel_size: int) -> jnp.ndarray:
    """A[t, s] such that (A @ x)[t] = mean over the length-`kernel_size` window
    centered at t of x with edge replication (matches _Moving_Avg, stride=1)."""
    if kernel_size % 2 == 0:
        raise ValueError("kernel_size must be odd (DLinear uses 25).")
    pad = (kernel_size - 1) // 2
    idx = jnp.arange(t_window + 2 * pad)
    src = jnp.clip(idx - pad, 0, t_window - 1)                     # padded -> source idx
    onehot = jax.nn.one_hot(src, t_window, dtype=jnp.float32)      # (P+2*pad, P)
    rows = [onehot[t:t + kernel_size].sum(axis=0) for t in range(t_window)]
    return jnp.stack(rows, axis=0) / float(kernel_size)            # (P, P)


def _pick_lane_tile(n_series: int, t_window: int, itemsize: int) -> int:
    """Lane-axis tile size.

    - N <= 256: use the full dim (legal per the (8,128) rule, single column tile).
    - Otherwise: multiple of 128, capped so one x tile is ~4 MB.  Double-buffered
      that is ~8 MB of x VMEM — under v5e's 16 MiB scoped default and well under
      v7x's 64 MiB physical VMEM, while staying >=85% of HBM roofline per the
      measured tiling data.
    """
    if n_series <= 256:
        return n_series
    budget_bytes = 4 * 1024 * 1024
    t = budget_bytes // max(1, t_window * itemsize)
    t = max(128, min(2048, (t // 128) * 128))
    return min(t, max(128, (n_series // 128) * 128))


@functools.partial(jax.jit, static_argnames=("out_len", "compute_dtype", "lane_tile"))
def dlinear_forward(x, ws, bs, wt, bt, avg_mat, *, out_len,
                    compute_dtype=jnp.float32, lane_tile=None):
    """x: (B, P, N, C) float32 -> (B, Q, N) float32 (shared/non-individual heads)."""
    B, P, N, _ = x.shape
    Q = out_len
    assert avg_mat.shape == (P, P), avg_mat.shape

    # Exact fold of decomposition + both heads into one effective GEMM.
    # HIGHEST precision: at production P the default matmul passes would drift
    # ~1e-3 vs. the PyTorch reference.
    w_eff = ws + jnp.dot(wt - ws, avg_mat, precision=jax.lax.Precision.HIGHEST)
    w_eff = w_eff.astype(compute_dtype)                            # (Q, P)
    b_sum = (bs + bt).reshape(Q, 1).astype(jnp.float32)            # (Q, 1) f32 always

    # Channel-0 slice only; no transposes — layout is expressed in BlockSpecs.
    x0 = x[..., 0].astype(compute_dtype)                           # (B, P, N)

    itemsize = jnp.dtype(compute_dtype).itemsize
    tn = lane_tile if lane_tile is not None else _pick_lane_tile(N, P, itemsize)
    assert tn == N or tn % 128 == 0, tn
    grid = (B, pl.cdiv(N, tn))

    out = pl.pallas_call(
        _dlinear_kernel,
        out_shape=jax.ShapeDtypeStruct((B, Q, N), jnp.float32),
        grid_spec=pltpu.PrefetchScalarGridSpec(
            num_scalar_prefetch=0,
            grid=grid,
            in_specs=[
                # x: batch dim squeezed, full time window, lane tile of series.
                pl.BlockSpec((pl.Squeezed(), P, tn), lambda b, n: (b, 0, n)),
                # W_eff / bias: same block every grid step -> stay VMEM-resident.
                pl.BlockSpec((Q, P), lambda b, n: (0, 0)),
                pl.BlockSpec((Q, 1), lambda b, n: (0, 0)),
            ],
            out_specs=pl.BlockSpec((pl.Squeezed(), Q, tn), lambda b, n: (b, 0, n)),
        ),
        compiler_params=pltpu.CompilerParams(
            # No reduction axis: both grid axes are independent -> megacore
            # sharding across v7x's two TensorCores.
            dimension_semantics=("parallel", "parallel")),
    )(x0, w_eff, b_sum)
    return out


def dlinear_reference(x, ws, bs, wt, bt, kernel_size, out_len):
    """Pure-JAX reference mirroring the PyTorch forward (individual=False)."""
    x0 = x[..., 0]                                                 # (B, P, N)
    pad = (kernel_size - 1) // 2
    front = jnp.repeat(x0[:, 0:1, :], pad, axis=1)
    end = jnp.repeat(x0[:, -1:, :], pad, axis=1)
    padded = jnp.concatenate([front, x0, end], axis=1)             # (B, P+2*pad, N)
    P = x0.shape[1]
    windows = jnp.stack([padded[:, t:t + kernel_size, :] for t in range(P)], axis=1)
    mm = windows.mean(axis=2)                                      # (B, P, N)
    res = x0 - mm
    seasonal_init = jnp.transpose(res, (0, 2, 1))                  # (B, N, P)
    trend_init = jnp.transpose(mm, (0, 2, 1))
    seasonal_out = seasonal_init @ ws.T + bs                       # (B, N, Q)
    trend_out = trend_init @ wt.T + bt
    return jnp.transpose(seasonal_out + trend_out, (0, 2, 1))      # (B, Q, N)


if __name__ == "__main__":
    # Module config (st_params): batch, t_window, n_series, channels; out_len.
    B, P, N, C = 2, 16, 8, 3
    Q = 8
    KERNEL_SIZE = 25
    # TODO(synk): individual=True (per-series Linear heads) is not implemented;
    # the single-GEMM fold only holds for shared heads (per-series would need a
    # batched/grouped GEMM).

    key = jax.random.PRNGKey(0)
    kx, kws, kbs, kwt, kbt, kx2 = jax.random.split(key, 6)
    x = jax.random.normal(kx, (B, P, N, C), dtype=jnp.float32)

    # nn.Linear(t_window, out_len): weight (Q, P), bias (Q,)
    scale = 1.0 / jnp.sqrt(jnp.float32(P))
    ws = jax.random.uniform(kws, (Q, P), jnp.float32, -scale, scale)
    bs = jax.random.uniform(kbs, (Q,), jnp.float32, -scale, scale)
    wt = jax.random.uniform(kwt, (Q, P), jnp.float32, -scale, scale)
    bt = jax.random.uniform(kbt, (Q,), jnp.float32, -scale, scale)

    avg_mat = _make_moving_avg_matrix(P, KERNEL_SIZE)
    ref = dlinear_reference(x, ws, bs, wt, bt, KERNEL_SIZE, Q)

    # 1) f32 path at the module's toy shape (single lane tile, grid=(B, 1)).
    out = jax.block_until_ready(
        dlinear_forward(x, ws, bs, wt, bt, avg_mat, out_len=Q))
    assert out.shape == (B, Q, N), out.shape
    assert jnp.allclose(out, ref, atol=2e-5, rtol=2e-5), (
        float(jnp.max(jnp.abs(out - ref))))

    # 2) bf16 x / W_eff with f32 accumulation (the HBM-bound production config).
    out_bf16 = jax.block_until_ready(
        dlinear_forward(x, ws, bs, wt, bt, avg_mat, out_len=Q,
                        compute_dtype=jnp.bfloat16))
    assert jnp.allclose(out_bf16, ref, atol=5e-2, rtol=5e-2), (
        float(jnp.max(jnp.abs(out_bf16 - ref))))

    # 3) Multi-tile lane grid (N=256, forced tN=128 -> grid=(B, 2)) to exercise
    #    the tiled / resident-weight path.
    x_big = jax.random.normal(kx2, (B, P, 256, C), dtype=jnp.float32)
    ref_big = dlinear_reference(x_big, ws, bs, wt, bt, KERNEL_SIZE, Q)
    out_big = jax.block_until_ready(
        dlinear_forward(x_big, ws, bs, wt, bt, avg_mat, out_len=Q, lane_tile=128))
    assert out_big.shape == (B, Q, 256), out_big.shape
    assert jnp.allclose(out_big, ref_big, atol=2e-5, rtol=2e-5), (
        float(jnp.max(jnp.abs(out_big - ref_big))))

    print("KERNEL_OK")
</pallas_src>

<mosaic_0001>
module attributes {stable_mosaic.version = 11 : i64} {
  func.func @_dlinear_kernel(%arg0: i32, %arg1: i32, %arg2: memref<1x16x8xf32, #tpu.memory_space<vmem>>, %arg3: memref<8x16xf32, #tpu.memory_space<vmem>>, %arg4: memref<8x1xf32, #tpu.memory_space<vmem>>, %arg5: memref<1x8x8xf32, #tpu.memory_space<vmem>>) attributes {dimension_semantics = [#tpu.dimension_semantics<parallel>, #tpu.dimension_semantics<parallel>], iteration_bounds = array<i64: 2, 1>, scalar_prefetch = 0 : i64, scratch_operands = 0 : i64, tpu.core_type = #tpu.core_type<tc>, window_params = [{transform_indices = @transform_0, window_bounds = array<i64: 1, 16, 8>}, {pipeline_mode = #tpu.pipeline_mode<synchronous>, transform_indices = @transform_1, window_bounds = array<i64: 8, 16>}, {pipeline_mode = #tpu.pipeline_mode<synchronous>, transform_indices = @transform_2, window_bounds = array<i64: 8, 1>}, {transform_indices = @transform_3, window_bounds = array<i64: 1, 8, 8>}]} {
    %c0 = arith.constant 0 : index
    %c0_0 = arith.constant 0 : index
    %0 = vector.load %arg3[%c0, %c0_0] : memref<8x16xf32, #tpu.memory_space<vmem>>, vector<8x16xf32>
    %c0_1 = arith.constant 0 : index
    %c0_2 = arith.constant 0 : index
    %c0_3 = arith.constant 0 : index
    %1 = vector.load %arg2[%c0_1, %c0_2, %c0_3] : memref<1x16x8xf32, #tpu.memory_space<vmem>>, vector<1x16x8xf32>
    %2 = vector.shape_cast %1 : vector<1x16x8xf32> to vector<16x8xf32>
    %cst = arith.constant dense<0.000000e+00> : vector<8x8xf32>
    %3 = tpu.matmul %0, %2, %cst {dimension_numbers = #tpu.dot_dimension_numbers<[1], [0], [0], [1], [0, 0, 1, 1], [], []>} : vector<8x16xf32>, vector<16x8xf32>, vector<8x8xf32> -> vector<8x8xf32>
    %c0_4 = arith.constant 0 : index
    %c0_5 = arith.constant 0 : index
    %4 = vector.load %arg4[%c0_4, %c0_5] : memref<8x1xf32, #tpu.memory_space<vmem>>, vector<8x1xf32>
    %5 = vector.broadcast %4 : vector<8x1xf32> to vector<8x8xf32>
    %6 = arith.addf %3, %5 : vector<8x8xf32>
    %c0_6 = arith.constant 0 : index
    %c0_7 = arith.constant 0 : index
    %c0_8 = arith.constant 0 : index
    %7 = vector.load %arg5[%c0_6, %c0_7, %c0_8] : memref<1x8x8xf32, #tpu.memory_space<vmem>>, vector<1x8x8xf32>
    %8 = vector.shape_cast %7 : vector<1x8x8xf32> to vector<8x8xf32>
    %9 = vector.shape_cast %6 : vector<8x8xf32> to vector<1x8x8xf32>
    tpu.vector_store %arg5[%c0_6, %c0_7, %c0_8], %9 {strides = array<i32>} : memref<1x8x8xf32, #tpu.memory_space<vmem>>, vector<1x8x8xf32>,
    return
  }
  func.func @transform_0(%arg0: i32, %arg1: i32) -> (i32, i32, i32) {
    %c0_i32 = arith.constant 0 : i32
    %c0_i32_0 = arith.constant 0 : i32
    return %arg0, %c0_i32, %arg1 : i32, i32, i32
  }
  func.func @transform_1(%arg0: i32, %arg1: i32) -> (i32, i32) {
    %c0_i32 = arith.constant 0 : i32
    %c0_i32_0 = arith.constant 0 : i32
    %c0_i32_1 = arith.constant 0 : i32
    return %c0_i32, %c0_i32_0 : i32, i32
  }
  func.func @transform_2(%arg0: i32, %arg1: i32) -> (i32, i32) {
    %c0_i32 = arith.constant 0 : i32
    %c0_i32_0 = arith.constant 0 : i32
    %c0_i32_1 = arith.constant 0 : i32
    return %c0_i32, %c0_i32_0 : i32, i32
  }
  func.func @transform_3(%arg0: i32, %arg1: i32) -> (i32, i32, i32) {
    %c0_i32 = arith.constant 0 : i32
    %c0_i32_0 = arith.constant 0 : i32
    return %arg0, %c0_i32, %arg1 : i32, i32, i32
  }
}

</mosaic_0001>

<bundles_post_ra>
// kernel: dlinear_forward.1
= control target key start
LH: loop header
LB: loop body
LE: loop exit
PB: predicated region body
PF: predicated region fallthrough
CT: control target
= control target key end

     0   :  { %8 = vsyncpa [#allocation3], 0  ;;  %s678_s0 = inlined_call_operand.vmem [shape: f32[2,16,8], index: 0, kind: input, shape index: {}]   ;;  %s679_s1 = inlined_call_operand.vmem [shape: f32[8,16], index: 1, kind: input, shape index: {}]   ;;  %s680_s2 = inlined_call_operand.vmem [shape: f32[8,1], index: 2, kind: input, shape index: {}]   ;;  %s681_s3 = inlined_call_operand.hbm [shape: f32[2,8,8], index: 3, kind: output, shape index: {}]  }
   0x1   :  { %10 = vsyncpa [#allocation3 + $0x1], 0  ;;  %s560_s12 = smov 0   ;;  %s562_s13 = smov 0  }
   0x2   :  { %s564_s14 = smov 0   ;;  %s566_s15 = smov 0  }
   0x3   :  { %s568_s16 = smov 0   ;;  %s570_s17 = smov 0  }
   0x4 LB: > { %s368_s18 = sadd.s32 4294967295, %s533_s17   ;;  %s369_s19 = sadd.s32 4294967294, %s533_s17   ;;  %s533_s17 = sphi %s570_s17, %s16_s17   ;;  %s529_s16 = sphi %s568_s16, %s688_s16   ;;  %s525_s15 = sphi %s566_s15, %s687_s15   ;;  %s521_s14 = sphi %s564_s14, %s686_s14   ;;  %s517_s13 = sphi %s562_s13, %s685_s13   ;;  %s513_s12 = sphi %s560_s12, %s684_s12  }
   0x5   : > { %s28_s20 = sadd.s32 1, %s529_s16  ;;  %s107_s21 = sadd.s32 1, %s521_s14 }
   0x6   : > { %p30_p0 = scmp.ge.s32.totalorder %s28_s20, 2  ;;  %p117_p1 = scmp.ne.s32.totalorder %s521_s14, %s517_s13 }
   0x7   : > { %p118_p2 = scmp.eq.s32.totalorder %s368_s18, 1  ;;  %p123_p3 = scmp.ne.s32.totalorder %s517_s13, %s513_s12 }
   0x8   : > { %s690_s20 = smov (%p30_p0, %s28_s20), 0  ;;  %p124_p5 = scmp.eq.s32.totalorder %s369_s19, 1 }
   0x9   : > { %p600_p4 = por %p118_p2, %p117_p1  ;;  %s102_s23 = ssub.s32 %s529_s16, %s690_s20 }
   0xa   : > { %p372_p6 = scmp.ge.s32.totalorder %s533_s17, 1  ;;  %p105_p7 = scmp.eq.s32.totalorder %s102_s23, 0 }
   0xb   : > { %p607_p8 = por %p124_p5, %p123_p3  ;;  %p159_p9 = scmp.lt.s32.totalorder %s533_s17, 3 }
   0xc   : > { %s613_s25 = scalar_select %p105_p7, %s521_s14, %s107_s21  }
   0xd   : > { %p160_p10 = pnand %p372_p6, %p159_p9 }
   0xe   : > { %p186_p11 = scmp.lt.s32.totalorder (!%p160_p10), %s525_s15, 1  ;;  %v535_v0 = vmov (!%p160_p10), 0.0|0.0   ;;  %vm536_vm0 = vmmov (!%p160_p10), 0   ;;  %v537_v1 = vmov (!%p160_p10), 0.0   ;;  %v197_v2 = vld [vmem:[%s680_s2] sm:$0xff] (!%p160_p10)  ;;  %v538_v3 = vmov (!%p160_p10), 0  }
   0xf   : > { %163 = sbr.rel (%p160_p10) target bundleno = 260 (0x104), region = 32  ;;  %392 = vmatprep.subr.bf16.mxu0 (!%p160_p10), %v535_v0  ;;  %389 = vmatprep.mubr.msk.f32.mxu0 (!%p160_p10), %vm536_vm0, %v537_v1  ;;  %v194_v7 = vld [vmem:[%s679_s1] sm:$0xff] (!%p160_p10)  ;;  %vm203_vm1 = vcmask (!%p160_p10), 130048   ;;  %s183_s8 = sand.u32 (!%p160_p10), 1, %s517_s13   ;;  %vm277_vm2 = vcmask (!%p160_p10), 64512  }
  0x10   : > { %454 = vset.pattern.permute.xlu0 (!%p160_p10), %v538_v3  ;;  %s373_s9 = sshll.u32 (!%p160_p10), %s183_s8, 3  ;;  %s378_s10 = sshll.u32 (!%p160_p10), %s525_s15, 7 }
  0x11   : > { %200 = vperm.xlu0 (!%p160_p10), %454, %v197_v2   ;;  %s185_s11 = scalar_lea.vmem (!%p160_p10), [#allocation2], %s373_s9  ;;  %s631_s23 = scalar_lea.hbm (!%p160_p10), %s681_s3, %s378_s10 }
  0x12   : > { %s294_s18 = sshll.u32 (!%p160_p10), %s185_s11, 4  ;;  %s280_s26 = scalar_lea.sflag (!%p160_p10), [#allocation3], %s183_s8  ;;  %s633_s18 = int_to_ptr.vmem [resolvable:$true] %s294_s18 }
  0x13   : > { %s455_s27 = scalar_lea.vmem (!%p160_p10), %s633_s18, 128 }
  0x14   : > { %p456_p12 = scmp.ne.s32.totalorder (!%p160_p10), %s633_s18, %s455_s27 }
  0x16   : > { %s187_s28 = scalar_select %p186_p11, %s525_s15, 1 }
  0x17   : > { %p457_p13 = pnand %p456_p12, %p600_p4  ;;  %s539_s15 = smov [#allocation2]  }
  0x18   : > { %s381_s29 = sshll.u32 %s187_s28, 4  ;;  %s459_s28 = sshll.u32 %s539_s15, 4  ;;  %s460_s28 = int_to_ptr.vmem [resolvable:$false] %s459_s28 }
  0x19   : > { %s193_s5 = scalar_lea.vmem %s678_s0, %s381_s29  ;;  %p458_p0 = pneg %p457_p13 }
  0x1a   : > { %v195_v4 = vld [vmem:[%s193_s5] sm:$0xff]  ;;  %v196_v5 = vld [vmem:[%s193_s5 + $0x8] sm:$0xff]  ;;  %s461_s29 = scalar_lea.vmem %s460_s28, 256  ;;  %p462_p1 = scmp.lt.s32.totalorder %s633_s18, %s460_s28 }
  0x1b   : > { %v393_v6 = vpack.c.bf16 %v196_v5, %v195_v4  ;;  %p463_p2 = scmp.lt.s32.totalorder %s461_s29, %s455_s27 }
  0x1d   : > { %394 = vmatpush3.bf16.msra.mxu0 %v393_v6  ;;  %p464_p3 = por %p463_p2, %p462_p1 }
  0x1f   : > { %p465_p5 = pnand %p464_p3, %p458_p0 }
  0x20   : > { %390 = vmatmul.mubr.msk.f32.vlgmr.msra.gmra.mrb[0].mxu0 %vm203_vm1, %v194_v7 }
  0x90   : > { %v201_v8 = vpop.permute.xlu0 %200 }
  0xf3   : > { %v273_v9 = vpop.f32.mrb[0].mxu0 }
  0xf4   : > { %v274_v10 = vadd.f32 %v273_v9, %v201_v8  ;;  %v391_v11 = vpop.f32.mrb[1].mxu0 }
  0xf6   : > { %278 = vst.msk [vmem:[%s185_s11] sm:$0xff] %vm277_vm2, %v274_v10 }
  0xf7   : > { %468 = shalt.err (!%p465_p5)
}
  0xf8   : > { %s469_s30 = scalar_lea.hbm %s631_s23, 128  ;;  %s473_s6 = scalar_lea.hbm %s681_s3, 256 }
  0xf9   : > { %p470_p6 = scmp.ne.s32.totalorder %s631_s23, %s469_s30  ;;  %p474_p10 = scmp.lt.u32.totalorder %s631_s23, %s681_s3 }
  0xfa   : > { %p475_p11 = scmp.lt.u32.totalorder %s473_s6, %s469_s30  ;;  %p477_p13 = scmp.lt.u32.totalorder %s469_s30, %s631_s23 }
  0xfb   : > { %p471_p7 = pnand %p470_p6, %p600_p4 }
  0xfc   : > { %p476_p12 = por %p475_p11, %p474_p10 }
  0xfd   : > { %p472_p9 = pneg %p471_p7 }
  0xfe   : > { %p478_p0 = por %p477_p13, %p476_p12 }
 0x100   : > { %p479_p1 = pnand %p478_p0, %p472_p9 }
 0x102   : > { %482 = shalt.err (!%p479_p1)
}
 0x103   : > { %395 = dma.vmem_to_hbm [thread:$0]  (%p600_p4), %s633_s18, 128, %s631_s23, %s280_s26  }
 0x104 PF: > { %p401_p2 = scmp.ge.s32.totalorder %s533_s17, 2  ;;  %s306_s9 = sand.u32 1, %s513_s12  }
 0x105   : > { %s307_s10 = scalar_lea.sflag [#allocation3], %s306_s9 }
 0x106   : > { %p398_p3 = pnand %p401_p2, %p607_p8 }
 0x108   : > { %508 = dma.done.wait (!%p398_p3), %s307_s10, 128  }
 0x109   : > { %510 = vsyncadd (!%p398_p3), %s307_s10, 4294967168  ;;  %s16_s17 = sadd.s32 1, %s533_s17   ;;  %s684_s12 = smov %s517_s13 }
 0x10a   : > { %p13_p5 = scmp.ge.s32.totalorder %s16_s17, 4   ;;  %s685_s13 = smov %s521_s14 }
 0x10b   : > { %s686_s14 = smov %s613_s25  ;;  %s687_s15 = smov %s529_s16 }
 0x10c   : > { %s688_s16 = smov %s690_s20  ;;  %15 = sbr.rel (!%p13_p5) target bundleno = 4 (0x4), region = 67 }
 0x113   :  { %312 = vsyncpa [#allocation3], 1 }
 0x114   :  { %314 = vsyncpa [#allocation3 + $0x1], 1 }

</bundles_post_ra>
